<compile_context>
chip_gen: v6e
topology: v6e:2x2x1
jax: 0.10.0
libtpu: 0.0.40
codegen_flags: <defaults>
</compile_context>

<pallas_src>
import jax
import jax.numpy as jnp
from jax.experimental import pallas as pl
from jax.experimental.pallas import tpu as pltpu

LEAKY_SLOPE = 0.20  # net_utils.activation_func('leaky_relu') -> LeakyReLU(0.20)


# ----------------------------- tiling helpers -------------------------------------------

def _round_up(v, m):
    return ((v + m - 1) // m) * m


def _k_tiling(K):
    """Reduction (k*k*Cin) axis: pad to 128 multiple, pick largest clean tile."""
    Kp = _round_up(K, 128)
    if Kp % 512 == 0:
        tk = 512
    elif Kp % 256 == 0:
        tk = 256
    else:
        tk = 128
    return tk, Kp


def _n_tiling(C):
    """Output-channel axis: lane-dense (>=128); 256-wide tiles when they fit cleanly."""
    Cp = _round_up(C, 128)
    tn = 256 if Cp % 256 == 0 else 128
    return tn, Cp


def _m_tiling(M):
    """Row (N*Ho*Wo) axis: bf16-sublane friendly (16), 256-row tiles for large M."""
    Mp = _round_up(M, 16)
    if Mp <= 256:
        return Mp, Mp
    tm = 256
    return tm, _round_up(M, tm)


# ----------------------------- Pallas kernels ------------------------------------------

def _leaky(v):
    return jnp.where(v > 0, v, LEAKY_SLOPE * v)


def _mm_act_kernel(p_ref, w_ref, o_ref, acc_ref):
    # out = leaky_relu(patches @ W); K reduction over grid axis 2 (innermost).
    @pl.when(pl.program_id(2) == 0)
    def _():
        acc_ref[...] = jnp.zeros_like(acc_ref)

    acc_ref[...] += jnp.dot(p_ref[...], w_ref[...], preferred_element_type=jnp.float32)

    @pl.when(pl.program_id(2) == pl.num_programs(2) - 1)
    def _():
        o_ref[...] = _leaky(acc_ref[...]).astype(o_ref.dtype)


def _mm_act_res_add_kernel(p_ref, w_ref, r_ref, o_ref, acc_ref):
    # out = leaky_relu(leaky_relu(patches @ W) + residual)   (identity shortcut)
    @pl.when(pl.program_id(2) == 0)
    def _():
        acc_ref[...] = jnp.zeros_like(acc_ref)

    acc_ref[...] += jnp.dot(p_ref[...], w_ref[...], preferred_element_type=jnp.float32)

    @pl.when(pl.program_id(2) == pl.num_programs(2) - 1)
    def _():
        conv = _leaky(acc_ref[...])
        s = conv + r_ref[...].astype(jnp.float32)
        o_ref[...] = _leaky(s).astype(o_ref.dtype)


def _mm_act_res_proj_kernel(p_ref, w_ref, xp_ref, wp_ref, o_ref, acc_ref):
    # out = leaky_relu(leaky_relu(patches @ W) + xp @ Wproj)  (fused 1x1 projection)
    @pl.when(pl.program_id(2) == 0)
    def _():
        acc_ref[...] = jnp.zeros_like(acc_ref)

    acc_ref[...] += jnp.dot(p_ref[...], w_ref[...], preferred_element_type=jnp.float32)

    @pl.when(pl.program_id(2) == pl.num_programs(2) - 1)
    def _():
        conv = _leaky(acc_ref[...])
        proj = jnp.dot(xp_ref[...], wp_ref[...], preferred_element_type=jnp.float32)
        s = conv + proj
        o_ref[...] = _leaky(s).astype(o_ref.dtype)


def _maxpool_dense_kernel(x_ref, o_ref):
    # x_ref: (1, H+2, W+2, C) padded with -inf; o_ref: (1, H, W, C) dense 3x3 max.
    x = x_ref[0]
    H, W = o_ref.shape[1], o_ref.shape[2]
    r = jnp.maximum(jnp.maximum(x[0:H, :, :], x[1:H + 1, :, :]), x[2:H + 2, :, :])
    m = jnp.maximum(jnp.maximum(r[:, 0:W, :], r[:, 1:W + 1, :]), r[:, 2:W + 2, :])
    o_ref[0] = m


# ----------------------------- tiled fused matmul wrapper -------------------------------

def _matmul_fused(patches, conv, mode, residual=None, proj_patches=None, proj_conv=None):
    """patches: (M, K) f32.  conv['wm']: (K_pad, C_pad) bf16 (prepared).  Returns (M, Cout) f32."""
    M, K = patches.shape
    K_pad, C_pad = conv["wm"].shape
    TK, TN, Cout = conv["tk"], conv["tn"], conv["cout"]
    TM, M_pad = _m_tiling(M)

    p = jnp.pad(patches, ((0, M_pad - M), (0, K_pad - K))).astype(jnp.bfloat16)
    grid = (M_pad // TM, C_pad // TN, K_pad // TK)

    in_specs = [pl.BlockSpec((TM, TK), lambda i, j, k: (i, k)),
                pl.BlockSpec((TK, TN), lambda i, j, k: (k, j))]
    args = [p, conv["wm"]]

    if mode == "act":
        kernel = _mm_act_kernel
    elif mode == "act_res_add":
        r = jnp.pad(residual.astype(jnp.float32),
                    ((0, M_pad - M), (0, C_pad - Cout)))
        in_specs.append(pl.BlockSpec((TM, TN), lambda i, j, k: (i, j)))
        args.append(r)
        kernel = _mm_act_res_add_kernel
    elif mode == "act_res_proj":
        KP = proj_patches.shape[1]
        KP_pad = proj_conv["wm"].shape[0]
        xp = jnp.pad(proj_patches, ((0, M_pad - M), (0, KP_pad - KP))).astype(jnp.bfloat16)
        in_specs += [pl.BlockSpec((TM, KP_pad), lambda i, j, k: (i, 0)),
                     pl.BlockSpec((KP_pad, TN), lambda i, j, k: (0, j))]
        args += [xp, proj_conv["wm"]]
        kernel = _mm_act_res_proj_kernel
    else:
        raise ValueError(mode)

    out = pl.pallas_call(
        kernel,
        grid_spec=pltpu.PrefetchScalarGridSpec(
            num_scalar_prefetch=0,
            grid=grid,
            in_specs=in_specs,
            out_specs=pl.BlockSpec((TM, TN), lambda i, j, k: (i, j)),
            scratch_shapes=[pltpu.VMEM((TM, TN), jnp.float32)],
        ),
        out_shape=jax.ShapeDtypeStruct((M_pad, C_pad), jnp.float32),
        compiler_params=pltpu.CompilerParams(
            dimension_semantics=("parallel", "parallel", "arbitrary"),
            vmem_limit_bytes=32 * 1024 * 1024,
        ),
    )(*args)
    return out[:M, :Cout]


# ----------------------------- glue: im2col / layers ------------------------------------

def _im2col(x, k, stride, pad):
    """x: (N,H,W,C) NHWC -> patches (N*Ho*Wo, k*k*C), element order (kh, kw, c)."""
    N, H, W, C = x.shape
    xp = jnp.pad(x, ((0, 0), (pad, pad), (pad, pad), (0, 0)))
    Ho = (H + 2 * pad - k) // stride + 1
    Wo = (W + 2 * pad - k) // stride + 1
    cols = []
    for i in range(k):
        for j in range(k):
            cols.append(xp[:, i:i + stride * (Ho - 1) + 1:stride,
                           j:j + stride * (Wo - 1) + 1:stride, :])
    p = jnp.stack(cols, axis=0)                                   # (k*k, N, Ho, Wo, C)
    p = jnp.transpose(p, (1, 2, 3, 0, 4)).reshape(N * Ho * Wo, k * k * C)
    return p, (N, Ho, Wo)


def conv2d_act(x, conv):
    """Conv2d(k, s, pad=k//2, bias=False) + LeakyReLU.  x: (N,H,W,Cin) NHWC."""
    k, stride = conv["k"], conv["stride"]
    patches, (N, Ho, Wo) = _im2col(x, k, stride, k // 2)
    out = _matmul_fused(patches, conv, mode="act")
    return out.reshape(N, Ho, Wo, conv["cout"])


def maxpool2d_pallas(x, stride=2, pad=1):
    """torch.nn.MaxPool2d(kernel_size=3, stride=2, padding=1), NHWC."""
    N, H, W, C = x.shape
    neg = jnp.finfo(x.dtype).min
    xp = jnp.pad(x, ((0, 0), (pad, pad), (pad, pad), (0, 0)), constant_values=neg)
    Hp, Wp = H + 2 * pad, W + 2 * pad
    dense = pl.pallas_call(
        _maxpool_dense_kernel,
        grid=(N,),
        in_specs=[pl.BlockSpec((1, Hp, Wp, C), lambda n: (n, 0, 0, 0))],
        out_specs=pl.BlockSpec((1, H, W, C), lambda n: (n, 0, 0, 0)),
        out_shape=jax.ShapeDtypeStruct((N, H, W, C), x.dtype),
        compiler_params=pltpu.CompilerParams(dimension_semantics=("parallel",)),
    )(xp)
    return dense[:, ::stride, ::stride, :]


def resnet_block_forward(x, blk):
    """net_utils.ResNetBlock: conv1(3x3,s) -> conv2(3x3,1) + shortcut -> leaky."""
    c1 = conv2d_act(x, blk["conv1"])
    N, Ho, Wo, _ = c1.shape
    M = N * Ho * Wo
    Cout = blk["conv2"]["cout"]
    patches2, _ = _im2col(c1, 3, 1, 1)
    s = blk["stride"]
    if blk["proj"] is not None:
        xs = x[:, ::s, ::s, :] if s > 1 else x        # 1x1-conv stride-s sampling of x
        xp = xs.reshape(M, x.shape[-1])
        out = _matmul_fused(patches2, blk["conv2"], mode="act_res_proj",
                            proj_patches=xp, proj_conv=blk["proj"])
    else:                                             # identity shortcut (Cin==Cout, s==1)
        r = x.reshape(M, Cout)
        out = _matmul_fused(patches2, blk["conv2"], mode="act_res_add", residual=r)
    return out.reshape(N, Ho, Wo, Cout)


# ----------------------------- parameter init / prepare ---------------------------------

def _kaiming_uniform(key, cout, cin, k):
    fan_in = cin * k * k
    gain = (2.0 / (1.0 + LEAKY_SLOPE ** 2)) ** 0.5
    bound = gain * (3.0 / fan_in) ** 0.5
    return jax.random.uniform(key, (cout, cin, k, k), jnp.float32, -bound, bound)


def init_resnet_encoder_params(key, n_layer=18, input_channels=3,
                               n_filters=(32, 64, 128, 256, 256)):
    assert n_layer in (18, 34), "Only supports 18, 34 layer architecture"
    n_blocks = [2, 2, 2, 2] if n_layer == 18 else [3, 4, 6, 3]
    for _ in range(len(n_filters) - len(n_blocks) - 1):
        n_blocks = n_blocks + [n_blocks[-1]]
    assert len(n_filters) < 8 and len(n_filters) == len(n_blocks) + 1

    n_keys = 1 + 3 * sum(n_blocks)
    keys = iter(jax.random.split(key, n_keys))

    params = {"conv1": _kaiming_uniform(next(keys), n_filters[0], input_channels, 7)}
    stages = []
    in_ch = n_filters[0]
    for si, nb in enumerate(n_blocks):
        out_ch = n_filters[si + 1]
        stage_stride = 1 if si == 0 else 2
        blocks = []
        blk_in = in_ch
        for b in range(nb):
            blocks.append({
                "w1": _kaiming_uniform(next(keys), out_ch, blk_in, 3),
                "w2": _kaiming_uniform(next(keys), out_ch, out_ch, 3),
                "wproj": _kaiming_uniform(next(keys), out_ch, blk_in, 1),
                "stride": stage_stride if b == 0 else 1,
            })
            blk_in = out_ch
        stages.append(blocks)
        in_ch = out_ch
    params["stages"] = stages
    return params


def _prepare_conv(w, stride):
    """PyTorch-layout (Cout,Cin,k,k) weight -> padded bf16 (K_pad, C_pad) matmul matrix."""
    cout, cin, k, _ = w.shape
    K = k * k * cin
    wm = jnp.transpose(w, (2, 3, 1, 0)).reshape(K, cout)          # (kh, kw, cin) x cout
    tk, k_pad = _k_tiling(K)
    tn, c_pad = _n_tiling(cout)
    wm = jnp.pad(wm, ((0, k_pad - K), (0, c_pad - cout))).astype(jnp.bfloat16)
    return {"wm": wm, "k": k, "stride": stride, "cout": cout, "cin": cin,
            "K": K, "tk": tk, "tn": tn}


def prepare_encoder_params(params):
    """One-time weight prep: transpose/reshape/pad/bf16-cast every conv weight."""
    prepared = {"conv1": _prepare_conv(params["conv1"], stride=2)}
    stages = []
    for blocks in params["stages"]:
        pblocks = []
        for blk in blocks:
            s = int(blk["stride"])
            cout, cin = blk["w1"].shape[0], blk["w1"].shape[1]
            pblocks.append({
                "stride": s,
                "conv1": _prepare_conv(blk["w1"], stride=s),
                "conv2": _prepare_conv(blk["w2"], stride=1),
                "proj": (_prepare_conv(blk["wproj"], stride=s)
                         if (s != 1 or cin != cout) else None),
            })
        stages.append(pblocks)
    prepared["stages"] = stages
    return prepared


# ----------------------------- encoder forward ------------------------------------------

def resnet_encoder_forward(x_nchw, prepared):
    """Returns (latent, skips) in PyTorch NCHW layout, matching ResNetEncoder.forward."""
    x = jnp.transpose(x_nchw, (0, 2, 3, 1)).astype(jnp.float32)    # NCHW -> NHWC

    stage_outputs = []
    c1 = conv2d_act(x, prepared["conv1"])                          # conv1: 7x7 s2
    stage_outputs.append(c1)

    h = maxpool2d_pallas(c1)                                       # 3x3 s2 p1
    for blocks in prepared["stages"]:                              # blocks2 .. blocks5(+)
        for blk in blocks:
            h = resnet_block_forward(h, blk)
        stage_outputs.append(h)

    to_nchw = lambda t: jnp.transpose(t, (0, 3, 1, 2))
    latent = to_nchw(stage_outputs[-1])
    skips = [to_nchw(t) for t in stage_outputs[:-1]]
    return latent, skips


# ----------------------------- main ------------------------------------------------------

if __name__ == "__main__":
    key = jax.random.PRNGKey(0)
    kx, kp = jax.random.split(key)

    # Small PyTorch-style NCHW input: batch=2, channels=3, spatial=16
    x = jax.random.normal(kx, (2, 3, 16, 16), jnp.float32)
    params = init_resnet_encoder_params(kp, n_layer=18, input_channels=3,
                                        n_filters=(32, 64, 128, 256, 256))
    prepared = prepare_encoder_params(params)

    latent, skips = resnet_encoder_forward(x, prepared)
    latent = jax.block_until_ready(latent)
    skips = [jax.block_until_ready(s) for s in skips]

    assert latent.shape == (2, 256, 1, 1), latent.shape
    assert [tuple(s.shape) for s in skips] == [(2, 32, 8, 8), (2, 64, 4, 4),
                                               (2, 128, 2, 2), (2, 256, 1, 1)]
    assert jnp.all(jnp.isfinite(latent))

    print("KERNEL_OK")
</pallas_src>

<mosaic_0001>
module attributes {stable_mosaic.version = 11 : i64} {
  func.func @_mm_act_kernel(%arg0: i32, %arg1: i32, %arg2: i32, %arg3: memref<128x256xbf16, #tpu.memory_space<vmem>>, %arg4: memref<256x128xbf16, #tpu.memory_space<vmem>>, %arg5: memref<128x128xf32, #tpu.memory_space<vmem>>, %arg6: memref<128x128xf32, #tpu.memory_space<vmem>>) attributes {dimension_semantics = [#tpu.dimension_semantics<parallel>, #tpu.dimension_semantics<parallel>, #tpu.dimension_semantics<arbitrary>], iteration_bounds = array<i64: 1, 1, 1>, scalar_prefetch = 0 : i64, scratch_operands = 1 : i64, tpu.core_type = #tpu.core_type<tc>, window_params = [{transform_indices = @transform_0, window_bounds = array<i64: 128, 256>}, {transform_indices = @transform_1, window_bounds = array<i64: 256, 128>}, {transform_indices = @transform_2, window_bounds = array<i64: 128, 128>}]} {
    %c0_i32 = arith.constant 0 : i32
    %0 = arith.cmpi eq, %arg2, %c0_i32 : i32
    %1 = arith.extui %0 : i1 to i32
    %c0_i32_0 = arith.constant 0 : i32
    %2 = arith.cmpi ne, %1, %c0_i32_0 : i32
    scf.if %2 {
      %cst_10 = arith.constant 0.000000e+00 : f32
      %12 = vector.broadcast %cst_10 : f32 to vector<128x128xf32>
      %c0_11 = arith.constant 0 : index
      %c0_12 = arith.constant 0 : index
      %13 = vector.load %arg6[%c0_11, %c0_12] : memref<128x128xf32, #tpu.memory_space<vmem>>, vector<128x128xf32>
      tpu.vector_store %arg6[%c0_11, %c0_12], %12 {strides = array<i32>} : memref<128x128xf32, #tpu.memory_space<vmem>>, vector<128x128xf32>,
    } else {
    }
    %c0 = arith.constant 0 : index
    %c0_1 = arith.constant 0 : index
    %3 = vector.load %arg6[%c0, %c0_1] : memref<128x128xf32, #tpu.memory_space<vmem>>, vector<128x128xf32>
    %c0_2 = arith.constant 0 : index
    %c0_3 = arith.constant 0 : index
    %4 = vector.load %arg3[%c0_2, %c0_3] : memref<128x256xbf16, #tpu.memory_space<vmem>>, vector<128x256xbf16>
    %c0_4 = arith.constant 0 : index
    %c0_5 = arith.constant 0 : index
    %5 = vector.load %arg4[%c0_4, %c0_5] : memref<256x128xbf16, #tpu.memory_space<vmem>>, vector<256x128xbf16>
    %cst = arith.constant dense<0.000000e+00> : vector<128x128xf32>
    %6 = tpu.matmul %4, %5, %cst {dimension_numbers = #tpu.dot_dimension_numbers<[1], [0], [0], [1], [0, 0, 1, 1], [], []>} : vector<128x256xbf16>, vector<256x128xbf16>, vector<128x128xf32> -> vector<128x128xf32>
    %7 = arith.addf %3, %6 : vector<128x128xf32>
    %c0_6 = arith.constant 0 : index
    %c0_7 = arith.constant 0 : index
    %8 = vector.load %arg6[%c0_6, %c0_7] : memref<128x128xf32, #tpu.memory_space<vmem>>, vector<128x128xf32>
    tpu.vector_store %arg6[%c0_6, %c0_7], %7 {strides = array<i32>} : memref<128x128xf32, #tpu.memory_space<vmem>>, vector<128x128xf32>,
    %c0_i32_8 = arith.constant 0 : i32
    %9 = arith.cmpi eq, %arg2, %c0_i32_8 : i32
    %10 = arith.extui %9 : i1 to i32
    %c0_i32_9 = arith.constant 0 : i32
    %11 = arith.cmpi ne, %10, %c0_i32_9 : i32
    scf.if %11 {
      %c0_10 = arith.constant 0 : index
      %c0_11 = arith.constant 0 : index
      %12 = vector.load %arg6[%c0_10, %c0_11] : memref<128x128xf32, #tpu.memory_space<vmem>>, vector<128x128xf32>
      %cst_12 = arith.constant 0.000000e+00 : f32
      %13 = vector.broadcast %cst_12 : f32 to vector<128x128xf32>
      %14 = arith.cmpf ogt, %12, %13 : vector<128x128xf32>
      %cst_13 = arith.constant 2.000000e-01 : f32
      %15 = vector.broadcast %cst_13 : f32 to vector<128x128xf32>
      %16 = arith.mulf %15, %12 : vector<128x128xf32>
      %17 = arith.select %14, %12, %16 : vector<128x128xi1>, vector<128x128xf32>
      %c0_14 = arith.constant 0 : index
      %c0_15 = arith.constant 0 : index
      %18 = vector.load %arg5[%c0_14, %c0_15] : memref<128x128xf32, #tpu.memory_space<vmem>>, vector<128x128xf32>
      tpu.vector_store %arg5[%c0_14, %c0_15], %17 {strides = array<i32>} : memref<128x128xf32, #tpu.memory_space<vmem>>, vector<128x128xf32>,
    } else {
    }
    return
  }
  func.func @transform_0(%arg0: i32, %arg1: i32, %arg2: i32) -> (i32, i32) {
    %c0_i32 = arith.constant 0 : i32
    return %arg0, %arg2 : i32, i32
  }
  func.func @transform_1(%arg0: i32, %arg1: i32, %arg2: i32) -> (i32, i32) {
    %c0_i32 = arith.constant 0 : i32
    return %arg2, %arg1 : i32, i32
  }
  func.func @transform_2(%arg0: i32, %arg1: i32, %arg2: i32) -> (i32, i32) {
    %c0_i32 = arith.constant 0 : i32
    return %arg0, %arg1 : i32, i32
  }
}

</mosaic_0001>

<bundles_post_ra>
// kernel: tpu_custom_call.1
= control target key start
LH: loop header
LB: loop body
LE: loop exit
PB: predicated region body
PF: predicated region fallthrough
CT: control target
= control target key end

     0   :  { %7 = vsyncpa [#allocation4], 0  ;;  %s793_s0 = inlined_call_operand.hbm [shape: bf16[128,256], index: 0, kind: input, shape index: {}]   ;;  %s794_s1 = inlined_call_operand.hbm [shape: bf16[256,128], index: 1, kind: input, shape index: {}]   ;;  %s795_s2 = inlined_call_operand.hbm [shape: f32[128,128], index: 2, kind: output, shape index: {}]  }
   0x1   :  { %8 = vsyncpa [#allocation7], 0 }
   0x2   :  { %9 = vsyncpa [#allocation5], 0  ;;  %s756_s9 = smov [#allocation3]  }
   0x3   :  { %s15_s10 = sshll.u32 %s756_s9, 4  ;;  %s16_s10 = int_to_ptr.vmem [resolvable:$true] %s15_s10 }
   0x4   :  { %s698_s11 = scalar_lea.vmem %s16_s10, 2048  ;;  %p703_p1 = scmp.lt.s32.totalorder %s16_s10, %s16_s10 }
   0x5   :  { %p699_p0 = scmp.ne.s32.totalorder %s16_s10, %s698_s11  ;;  %p704_p2 = scmp.lt.s32.totalorder %s698_s11, %s698_s11 }
   0x7   :  { %p705_p3 = por %p704_p2, %p703_p1 }
   0x9   :  { %p706_p4 = pnand %p705_p3, %p699_p0 }
   0xb   :  { %709 = shalt.err (!%p706_p4)
}
   0xc   :  { %s757_s12 = smov 128   ;;  %s758_s13 = smov 8  }
   0xd   :  { %21 = dma.hbm_to_vmem [thread:$0]  %s793_s0, 2048, %s16_s10, [#allocation4], %s757_s12, %s757_s12, %s758_s13  }
   0xe   :  { %s759_s16 = smov [#allocation6]  }
   0xf   :  { %s27_s17 = sshll.u32 %s759_s16, 4  ;;  %s28_s17 = int_to_ptr.vmem [resolvable:$true] %s27_s17 }
  0x10   :  { %s718_s18 = scalar_lea.vmem %s28_s17, 2048  ;;  %p723_p6 = scmp.lt.s32.totalorder %s28_s17, %s28_s17 }
  0x11   :  { %p719_p5 = scmp.ne.s32.totalorder %s28_s17, %s718_s18  ;;  %p724_p7 = scmp.lt.s32.totalorder %s718_s18, %s718_s18 }
  0x13   :  { %p725_p8 = por %p724_p7, %p723_p6 }
  0x15   :  { %p726_p9 = pnand %p725_p8, %p719_p5 }
  0x17   :  { %729 = shalt.err (!%p726_p9)
}
  0x18   :  { %s760_s19 = smov 64   ;;  %s761_s20 = smov 4  }
  0x19   :  { %33 = dma.hbm_to_vmem [thread:$0]  %s794_s1, 2048, %s28_s17, [#allocation7], %s760_s19, %s760_s19, %s761_s20  }
  0x1a   :  { %750 = dma.done.wait [#allocation4], 2048  }
  0x1b   :  { %751 = vsyncadd [#allocation4], 4294965248 }
  0x1c   :  { %752 = dma.done.wait [#allocation7], 2048  }
  0x1d   :  { %753 = vsyncadd [#allocation7], 4294965248  ;;  %v650_v0 = vld [vmem:[#allocation6 + $0x78] sm:$0xff]   ;;  %v652_v2 = vld [vmem:[#allocation6 + $0x70] sm:$0xff]   ;;  %s762_s0 = smov [#allocation8]  }
  0x1e   :  { %v651_v1 = vld [vmem:[#allocation6 + $0x38] sm:$0xff]   ;;  %563 = vmatprep.subr.bf16.mxu0 %v650_v0  ;;  %627 = vmatprep.subr.bf16.mxu1 %v650_v0  ;;  %v653_v3 = vld [vmem:[#allocation6 + $0x30] sm:$0xff]   ;;  %v654_v4 = vld [vmem:[#allocation6 + $0x68] sm:$0xff]   ;;  %s518_s1 = sshll.u32 %s762_s0, 4  ;;  %s519_s1 = int_to_ptr.vmem [resolvable:$true] %s518_s1 }
  0x1f   :  { %564 = vmatpush3.bf16.msra.mxu0 %v651_v1  ;;  %635 = vmatpush3.bf16.msra.mxu1 %v651_v1  ;;  %v655_v5 = vld [vmem:[#allocation6 + $0x28] sm:$0xff]   ;;  %v656_v6 = vld [vmem:[#allocation6 + $0x60] sm:$0xff]   ;;  %v658_v8 = vld [vmem:[#allocation6 + $0x58] sm:$0xff]   ;;  %s730_s23 = scalar_lea.vmem %s519_s1, 2048  ;;  %p735_p11 = scmp.lt.s32.totalorder %s519_s1, %s519_s1 }
  0x20   :  { %565 = vmatprep.subr.bf16.mxu0 %v652_v2  ;;  %628 = vmatprep.subr.bf16.mxu1 %v652_v2  ;;  %v657_v7 = vld [vmem:[#allocation6 + $0x20] sm:$0xff]   ;;  %v659_v9 = vld [vmem:[#allocation6 + $0x18] sm:$0xff]   ;;  %v660_v10 = vld [vmem:[#allocation6 + $0x50] sm:$0xff]   ;;  %p731_p10 = scmp.ne.s32.totalorder %s519_s1, %s730_s23  ;;  %p736_p12 = scmp.lt.s32.totalorder %s730_s23, %s730_s23 }
  0x21   :  { %v668_v11 = vld [vmem:[#allocation3 + $0x4] ss:$8 sps:$4 sm:$0xff]   ;;  %v661_v13 = vld [vmem:[#allocation6 + $0x10] sm:$0xff]   ;;  %v666_v18 = vld [vmem:[#allocation3] ss:$8 sps:$4 sm:$0xff]  }
  0x22   :  { %v671_v12 = vld [vmem:[#allocation3 + $0x44] ss:$8 sps:$4 sm:$0xff]   ;;  %333 = vmatprep.mubr.bf16.mxu0 %v668_v11  ;;  %v669_v19 = vld [vmem:[#allocation3 + $0x40] ss:$8 sps:$4 sm:$0xff]   ;;  %v672_v20 = vld [vmem:[#allocation3 + $0x14] ss:$8 sps:$4 sm:$0xff]   ;;  %p737_p13 = por %p736_p12, %p735_p11 }
  0x23   :  { %566 = vmatpush3.bf16.msra.mxu0 %v653_v3  ;;  %636 = vmatpush3.bf16.msra.mxu1 %v653_v3  ;;  %v662_v14 = vld [vmem:[#allocation6 + $0x48] sm:$0xff]   ;;  %v664_v16 = vld [vmem:[#allocation6 + $0x40] sm:$0xff]   ;;  %v674_v21 = vld [vmem:[#allocation3 + $0x54] ss:$8 sps:$4 sm:$0xff]  }
  0x24   :  { %567 = vmatprep.subr.bf16.mxu0 %v654_v4  ;;  %629 = vmatprep.subr.bf16.mxu1 %v654_v4  ;;  %v663_v15 = vld [vmem:[#allocation6 + $0x8] sm:$0xff]   ;;  %v665_v17 = vld [vmem:[#allocation6] sm:$0xff]   ;;  %v676_v22 = vld [vmem:[#allocation3 + $0x10] ss:$8 sps:$4 sm:$0xff]   ;;  %p738_p0 = pnand %p737_p13, %p731_p10 }
  0x25   :  { %365 = vmatprep.mubr.bf16.mxu1 %v671_v12  ;;  %v677_v23 = vld [vmem:[#allocation3 + $0x50] ss:$8 sps:$4 sm:$0xff]   ;;  %v678_v24 = vld [vmem:[#allocation3 + $0x24] ss:$8 sps:$4 sm:$0xff]   ;;  %v682_v26 = vld [vmem:[#allocation3 + $0x20] ss:$8 sps:$4 sm:$0xff]  }
  0x26   :  { %v680_v25 = vld [vmem:[#allocation3 + $0x64] ss:$8 sps:$4 sm:$0xff]   ;;  %v683_v27 = vld [vmem:[#allocation3 + $0x60] ss:$8 sps:$4 sm:$0xff]   ;;  %v684_v28 = vld [vmem:[#allocation3 + $0x34] ss:$8 sps:$4 sm:$0xff]  }
  0x27   :  { %568 = vmatpush3.bf16.msra.mxu0 %v655_v5  ;;  %637 = vmatpush3.bf16.msra.mxu1 %v655_v5  ;;  %v686_v29 = vld [vmem:[#allocation3 + $0x74] ss:$8 sps:$4 sm:$0xff]   ;;  %v688_v30 = vld [vmem:[#allocation3 + $0x30] ss:$8 sps:$4 sm:$0xff]  }
  0x28   :  { %569 = vmatprep.subr.bf16.mxu0 %v656_v6  ;;  %630 = vmatprep.subr.bf16.mxu1 %v656_v6  ;;  %v689_v31 = vld [vmem:[#allocation3 + $0x70] ss:$8 sps:$4 sm:$0xff]  }
  0x2b   :  { %570 = vmatpush3.bf16.msra.mxu0 %v657_v7  ;;  %638 = vmatpush3.bf16.msra.mxu1 %v657_v7 }
  0x2c   :  { %571 = vmatprep.subr.bf16.mxu0 %v658_v8  ;;  %631 = vmatprep.subr.bf16.mxu1 %v658_v8 }
  0x2f   :  { %572 = vmatpush3.bf16.msra.mxu0 %v659_v9  ;;  %639 = vmatpush3.bf16.msra.mxu1 %v659_v9 }
  0x30   :  { %573 = vmatprep.subr.bf16.mxu0 %v660_v10  ;;  %632 = vmatprep.subr.bf16.mxu1 %v660_v10 }
  0x33   :  { %574 = vmatpush3.bf16.msra.mxu0 %v661_v13  ;;  %640 = vmatpush3.bf16.msra.mxu1 %v661_v13 }
  0x34   :  { %575 = vmatprep.subr.bf16.mxu0 %v662_v14  ;;  %633 = vmatprep.subr.bf16.mxu1 %v662_v14 }
  0x37   :  { %576 = vmatpush3.bf16.msra.mxu0 %v663_v15  ;;  %641 = vmatpush3.bf16.msra.mxu1 %v663_v15 }
  0x38   :  { %577 = vmatprep.subr.bf16.mxu0 %v664_v16  ;;  %634 = vmatprep.subr.bf16.mxu1 %v664_v16 }
  0x3b   :  { %578 = vmatpush3.bf16.msra.mxu0 %v665_v17  ;;  %642 = vmatpush3.bf16.msra.mxu1 %v665_v17 }
  0x3e   :  { %334 = vmatmul.mubr.bf16.vlgmr.msra.gmra.mxu0 %v666_v18  ;;  %366 = vmatmul.mubr.bf16.vlgmr.msra.gmra.mxu1 %v669_v19 }
  0x3f   :  { %341 = vmatprep.mubr.bf16.mxu0 %v672_v20  ;;  %373 = vmatprep.mubr.bf16.mxu1 %v674_v21 }
  0x46   :  { %342 = vmatmul.mubr.bf16.gmra.mxu0 %v676_v22  ;;  %374 = vmatmul.mubr.bf16.gmra.mxu1 %v677_v23 }
  0x47   :  { %349 = vmatprep.mubr.bf16.mxu0 %v678_v24  ;;  %381 = vmatprep.mubr.bf16.mxu1 %v680_v25 }
  0x4e   :  { %350 = vmatmul.mubr.bf16.gmra.mxu0 %v682_v26  ;;  %382 = vmatmul.mubr.bf16.gmra.mxu1 %v683_v27 }
  0x4f   :  { %357 = vmatprep.mubr.bf16.mxu0 %v684_v28  ;;  %389 = vmatprep.mubr.bf16.mxu1 %v686_v29 }
  0x56   :  { %358 = vmatmul.mubr.bf16.gmra.mxu0 %v688_v30  ;;  %390 = vmatmul.mubr.bf16.gmra.mxu1 %v689_v31 }
  0xfe   :  { %v579_v32 = vpop.f32.mrf.mxu0  ;;  %v603_v33 = vpop.f32.mrf.mxu1 }
 0x100   :  { %v580_v34 = vpop.f32.mrf.mxu0  ;;  %v604_v35 = vpop.f32.mrf.mxu1 }
 0x101   :  { %v581_v36 = vadd.f32 %v580_v34, %v579_v32  ;;  %v605_v37 = vadd.f32 %v604_v35, %v603_v33 }
 0x102   :  { %v582_v38 = vpop.f32.mrf.mxu0  ;;  %v606_v39 = vpop.f32.mrf.mxu1 }
 0x103   :  { %vm449_vm0 = vcmp.gt.f32.partialorder %v581_v36, 0.0  ;;  %v465_v40 = vmul.f32 0.2, %v581_v36  ;;  %vm457_vm1 = vcmp.gt.f32.partialorder %v605_v37, 0.0  ;;  %v473_v41 = vmul.f32 0.2, %v605_v37 }
 0x104   :  { %v583_v42 = vpop.f32.mrf.mxu0  ;;  %v607_v43 = vpop.f32.mrf.mxu1 }
 0x105   :  { %v481_v44 = vsel %vm449_vm0, %v581_v36, %v465_v40  ;;  %v489_v45 = vsel %vm457_vm1, %v605_v37, %v473_v41  ;;  %v584_v46 = vadd.f32 %v583_v42, %v582_v38  ;;  %v608_v47 = vadd.f32 %v607_v43, %v606_v39 }
 0x106   :  { %497 = vst [vmem:[#allocation8] sm:$0xff] %v481_v44  ;;  %505 = vst [vmem:[#allocation8 + $0x40] sm:$0xff] %v489_v45  ;;  %v585_v48 = vpop.f32.mrf.mxu0  ;;  %v609_v49 = vpop.f32.mrf.mxu1 }
 0x107   :  { %vm450_vm2 = vcmp.gt.f32.partialorder %v584_v46, 0.0  ;;  %v466_v50 = vmul.f32 0.2, %v584_v46  ;;  %vm458_vm3 = vcmp.gt.f32.partialorder %v608_v47, 0.0  ;;  %v474_v51 = vmul.f32 0.2, %v608_v47 }
 0x108   :  { %v586_v52 = vpop.f32.mrf.mxu0  ;;  %v610_v53 = vpop.f32.mrf.mxu1 }
 0x109   :  { %v482_v54 = vsel %vm450_vm2, %v584_v46, %v466_v50  ;;  %v490_v55 = vsel %vm458_vm3, %v608_v47, %v474_v51  ;;  %v587_v56 = vadd.f32 %v586_v52, %v585_v48  ;;  %v611_v57 = vadd.f32 %v610_v53, %v609_v49 }
 0x10a   :  { %498 = vst [vmem:[#allocation8 + $0x8] sm:$0xff] %v482_v54  ;;  %506 = vst [vmem:[#allocation8 + $0x48] sm:$0xff] %v490_v55  ;;  %v588_v58 = vpop.f32.mrf.mxu0  ;;  %v612_v59 = vpop.f32.mrf.mxu1 }
 0x10b   :  { %vm451_vm4 = vcmp.gt.f32.partialorder %v587_v56, 0.0  ;;  %v467_v60 = vmul.f32 0.2, %v587_v56  ;;  %vm459_vm5 = vcmp.gt.f32.partialorder %v611_v57, 0.0  ;;  %v475_v61 = vmul.f32 0.2, %v611_v57 }
 0x10c   :  { %v589_v62 = vpop.f32.mrf.mxu0  ;;  %v613_v63 = vpop.f32.mrf.mxu1 }
 0x10d   :  { %v483_v0 = vsel %vm451_vm4, %v587_v56, %v467_v60  ;;  %v491_v1 = vsel %vm459_vm5, %v611_v57, %v475_v61  ;;  %v590_v2 = vadd.f32 %v589_v62, %v588_v58  ;;  %v614_v3 = vadd.f32 %v613_v63, %v612_v59 }
 0x10e   :  { %499 = vst [vmem:[#allocation8 + $0x10] sm:$0xff] %v483_v0  ;;  %507 = vst [vmem:[#allocation8 + $0x50] sm:$0xff] %v491_v1  ;;  %v591_v4 = vpop.f32.mrf.mxu0  ;;  %v615_v5 = vpop.f32.mrf.mxu1 }
 0x10f   :  { %vm452_vm6 = vcmp.gt.f32.partialorder %v590_v2, 0.0  ;;  %v468_v6 = vmul.f32 0.2, %v590_v2  ;;  %vm460_vm7 = vcmp.gt.f32.partialorder %v614_v3, 0.0  ;;  %v476_v7 = vmul.f32 0.2, %v614_v3 }
 0x110   :  { %v592_v8 = vpop.f32.mrf.mxu0  ;;  %v616_v9 = vpop.f32.mrf.mxu1 }
 0x111   :  { %v484_v10 = vsel %vm452_vm6, %v590_v2, %v468_v6  ;;  %v492_v11 = vsel %vm460_vm7, %v614_v3, %v476_v7  ;;  %v593_v12 = vadd.f32 %v592_v8, %v591_v4  ;;  %v617_v13 = vadd.f32 %v616_v9, %v615_v5 }
 0x112   :  { %500 = vst [vmem:[#allocation8 + $0x18] sm:$0xff] %v484_v10  ;;  %508 = vst [vmem:[#allocation8 + $0x58] sm:$0xff] %v492_v11  ;;  %v594_v14 = vpop.f32.mrf.mxu0  ;;  %v618_v15 = vpop.f32.mrf.mxu1 }
 0x113   :  { %vm453_vm8 = vcmp.gt.f32.partialorder %v593_v12, 0.0  ;;  %v469_v16 = vmul.f32 0.2, %v593_v12  ;;  %vm461_vm9 = vcmp.gt.f32.partialorder %v617_v13, 0.0  ;;  %v477_v17 = vmul.f32 0.2, %v617_v13 }
 0x114   :  { %v595_v18 = vpop.f32.mrf.mxu0  ;;  %v619_v19 = vpop.f32.mrf.mxu1 }
 0x115   :  { %v485_v20 = vsel %vm453_vm8, %v593_v12, %v469_v16  ;;  %v493_v21 = vsel %vm461_vm9, %v617_v13, %v477_v17  ;;  %v596_v22 = vadd.f32 %v595_v18, %v594_v14  ;;  %v620_v23 = vadd.f32 %v619_v19, %v618_v15 }
 0x116   :  { %501 = vst [vmem:[#allocation8 + $0x20] sm:$0xff] %v485_v20  ;;  %509 = vst [vmem:[#allocation8 + $0x60] sm:$0xff] %v493_v21  ;;  %v597_v24 = vpop.f32.mrf.mxu0  ;;  %v621_v25 = vpop.f32.mrf.mxu1 }
 0x117   :  { %vm454_vm10 = vcmp.gt.f32.partialorder %v596_v22, 0.0  ;;  %v470_v26 = vmul.f32 0.2, %v596_v22  ;;  %vm462_vm11 = vcmp.gt.f32.partialorder %v620_v23, 0.0  ;;  %v478_v27 = vmul.f32 0.2, %v620_v23 }
 0x118   :  { %v598_v28 = vpop.f32.mrf.mxu0  ;;  %v622_v29 = vpop.f32.mrf.mxu1 }
 0x119   :  { %v486_v30 = vsel %vm454_vm10, %v596_v22, %v470_v26  ;;  %v494_v31 = vsel %vm462_vm11, %v620_v23, %v478_v27  ;;  %v599_v32 = vadd.f32 %v598_v28, %v597_v24  ;;  %v623_v33 = vadd.f32 %v622_v29, %v621_v25 }
 0x11a   :  { %502 = vst [vmem:[#allocation8 + $0x28] sm:$0xff] %v486_v30  ;;  %510 = vst [vmem:[#allocation8 + $0x68] sm:$0xff] %v494_v31  ;;  %v600_v34 = vpop.f32.mrf.mxu0  ;;  %v624_v35 = vpop.f32.mrf.mxu1 }
 0x11b   :  { %vm455_vm12 = vcmp.gt.f32.partialorder %v599_v32, 0.0  ;;  %v471_v36 = vmul.f32 0.2, %v599_v32  ;;  %vm463_vm13 = vcmp.gt.f32.partialorder %v623_v33, 0.0  ;;  %v479_v37 = vmul.f32 0.2, %v623_v33 }
 0x11c   :  { %v601_v38 = vpop.f32.mrf.mxu0  ;;  %v625_v39 = vpop.f32.mrf.mxu1 }
 0x11d   :  { %v487_v40 = vsel %vm455_vm12, %v599_v32, %v471_v36  ;;  %v495_v41 = vsel %vm463_vm13, %v623_v33, %v479_v37  ;;  %v602_v42 = vadd.f32 %v601_v38, %v600_v34  ;;  %v626_v43 = vadd.f32 %v625_v39, %v624_v35 }
 0x11e   :  { %503 = vst [vmem:[#allocation8 + $0x30] sm:$0xff] %v487_v40  ;;  %511 = vst [vmem:[#allocation8 + $0x70] sm:$0xff] %v495_v41 }
 0x11f   :  { %vm456_vm14 = vcmp.gt.f32.partialorder %v602_v42, 0.0  ;;  %v472_v44 = vmul.f32 0.2, %v602_v42  ;;  %vm464_vm15 = vcmp.gt.f32.partialorder %v626_v43, 0.0  ;;  %v480_v45 = vmul.f32 0.2, %v626_v43 }
 0x121   :  { %v488_v46 = vsel %vm456_vm14, %v602_v42, %v472_v44  ;;  %v496_v47 = vsel %vm464_vm15, %v626_v43, %v480_v45 }
 0x122   :  { %504 = vst [vmem:[#allocation8 + $0x38] sm:$0xff] %v488_v46  ;;  %512 = vst [vmem:[#allocation8 + $0x78] sm:$0xff] %v496_v47 }
 0x123   :  { %741 = shalt.err (!%p738_p0)
}
 0x124   :  { %524 = dma.vmem_to_hbm [thread:$0]  %s519_s1, 2048, %s795_s2, [#allocation5], %s757_s12, %s757_s12, %s758_s13  }
 0x125   :  { %754 = dma.done.wait [#allocation5], 2048  }
 0x126   :  { %755 = vsyncadd [#allocation5], 4294965248 }
 0x127   :  { %528 = vsyncpa [#allocation4], 1 }
 0x128   :  { %529 = vsyncpa [#allocation7], 1 }
 0x129   :  { %530 = vsyncpa [#allocation5], 1 }

</bundles_post_ra>
